<compile_context>
chip_gen: v5e
topology: v5e:2x2
jax: 0.10.0
libtpu: 0.0.40
codegen_flags: <defaults>
</compile_context>

<pallas_src>
import functools

import jax
import jax.numpy as jnp
from jax.experimental import pallas as pl
from jax.experimental.pallas import tpu as pltpu

LANE = 128
_COMPUTE_DTYPE = jnp.bfloat16


def _round_up(n, m):
    return ((n + m - 1) // m) * m


def cascor_kernel(x_ref, wh_ref, bh_ref, wcx_ref, wch_ref, bc_ref, out_ref, *, cp):
    # x:   [TB, Fp] bf16       wh:  [Fp, Hp] bf16      bh: [1, Hp] f32
    # wcx: [Fp, Cp] bf16       wch: [Hp, Cp] bf16      bc: [1, Cp] f32
    # out: [TB, Cp + Hp] f32   -> [:, :Cp] classifier logits, [:, Cp:] hidden features
    x = x_ref[...]

    # hidden cascade-correlation unit: Linear + tanh (f32 accumulation + activation)
    h32 = jnp.tanh(
        jnp.dot(x, wh_ref[...], preferred_element_type=jnp.float32) + bh_ref[...]
    )
    h = h32.astype(x.dtype)

    # new classifier on cat([x, h], dim=1)  ==  x @ Wcx + h @ Wch + bc
    y = (
        jnp.dot(x, wcx_ref[...], preferred_element_type=jnp.float32)
        + jnp.dot(h, wch_ref[...], preferred_element_type=jnp.float32)
        + bc_ref[...]
    )

    # cp is a static multiple of 128 -> both stores are lane-dense, unmasked full vregs
    out_ref[:, :cp] = y
    out_ref[:, cp:] = h32


def prepare_cascor_params(wh, bh, wc, bc, input_features, compute_dtype=_COMPUTE_DTYPE):
    """Transpose / split / pad / cast model weights once (hoisted out of the per-call path).

    wh: [H, F]  bh: [H]  wc: [C, F+H]  bc: [C]
    """
    H, F = wh.shape
    C = wc.shape[0]
    assert F == input_features
    Fp = _round_up(F, LANE)
    Hp = _round_up(H, LANE)
    Cp = _round_up(C, LANE)

    wh_t = jnp.zeros((Fp, Hp), compute_dtype).at[:F, :H].set(wh.T.astype(compute_dtype))
    bh_p = jnp.zeros((1, Hp), jnp.float32).at[0, :H].set(bh.astype(jnp.float32))
    wcx_t = jnp.zeros((Fp, Cp), compute_dtype).at[:F, :C].set(wc[:, :F].T.astype(compute_dtype))
    wch_t = jnp.zeros((Hp, Cp), compute_dtype).at[:H, :C].set(wc[:, F:].T.astype(compute_dtype))
    bc_p = jnp.zeros((1, Cp), jnp.float32).at[0, :C].set(bc.astype(jnp.float32))

    params = (wh_t, bh_p, wcx_t, wch_t, bc_p)
    dims = (F, H, C, Fp, Hp, Cp)  # static ints
    return params, dims


@functools.partial(jax.jit, static_argnames=("dims", "return_features", "block_b"))
def cascor_apply(x, params, dims, return_features=False, block_b=512):
    """x: [B, F] (any float dtype); params/dims from prepare_cascor_params."""
    F, H, C, Fp, Hp, Cp = dims
    wh_t, bh_p, wcx_t, wch_t, bc_p = params
    B = x.shape[0]
    assert x.shape[1] == F

    # Batch tile: multiple of 16 rows (bf16 packs 2 rows per sublane), capped at block_b.
    TB = min(block_b, _round_up(B, 16))
    Bp = _round_up(B, TB)
    n_blocks = Bp // TB
    W = Cp + Hp

    # Pad + cast the activation (only array that scales with B) to bf16.
    xp = jnp.zeros((Bp, Fp), wh_t.dtype).at[:B, :F].set(x.astype(wh_t.dtype))

    # VMEM budget: double-buffered x/out tiles + resident weights, 2x headroom,
    # clamped to 32 MiB (safe on v7x's smaller VMEM as well as v5e/v6e).
    tile_bytes = TB * Fp * xp.dtype.itemsize + TB * W * 4
    weight_bytes = sum(int(a.size) * a.dtype.itemsize for a in params)
    vmem_limit = int(min(max(4 * tile_bytes + 2 * weight_bytes, 8 << 20), 32 << 20))

    out_full = pl.pallas_call(
        functools.partial(cascor_kernel, cp=Cp),
        out_shape=jax.ShapeDtypeStruct((Bp, W), jnp.float32),
        grid=(n_blocks,),
        in_specs=[
            pl.BlockSpec((TB, Fp), lambda i: (i, 0)),   # x: tiled over batch
            pl.BlockSpec((Fp, Hp), lambda i: (0, 0)),   # weights: VMEM-resident
            pl.BlockSpec((1, Hp), lambda i: (0, 0)),
            pl.BlockSpec((Fp, Cp), lambda i: (0, 0)),
            pl.BlockSpec((Hp, Cp), lambda i: (0, 0)),
            pl.BlockSpec((1, Cp), lambda i: (0, 0)),
        ],
        out_specs=pl.BlockSpec((TB, W), lambda i: (i, 0)),  # fused lane-dense slab
        compiler_params=pltpu.CompilerParams(
            dimension_semantics=("parallel",),   # batch axis shards across v7x's 2 TCs
            vmem_limit_bytes=vmem_limit,
        ),
    )(xp, wh_t, bh_p, wcx_t, wch_t, bc_p)

    out = out_full[:B, :C]
    if return_features:
        feat = out_full[:B, Cp:Cp + H]
        return out, feat
    return out


def cascor_forward(x, wh, bh, wc, bc, input_features, return_features=False):
    """Convenience one-shot API. For inference loops, call prepare_cascor_params once
    and reuse its result with cascor_apply."""
    params, dims = prepare_cascor_params(wh, bh, wc, bc, input_features)
    return cascor_apply(x, params, dims, return_features=return_features)


if __name__ == "__main__":
    # Small, deterministic shapes consistent with the module:
    #   inputs: [batch, input_features]; net_size new hidden units; num_classes outputs.
    # NOTE: at these toy sizes the kernel is launch/DMA-latency bound; the tiling pays
    # off only for large batches (or a large candidate-unit pool).
    B, F, H, C = 8, 32, 16, 4   # batch, input_features, net_size, num_classes
    key = jax.random.PRNGKey(0)
    kx, kwh, kbh, kwc_old, kbc, kwc_new = jax.random.split(key, 6)

    x = jax.random.normal(kx, (B, F), dtype=jnp.float32)

    # hidden module params: Linear(F -> H) + tanh
    wh = jax.random.normal(kwh, (H, F), dtype=jnp.float32) * 0.1
    bh = jax.random.normal(kbh, (H,), dtype=jnp.float32) * 0.1

    # original classifier: Linear(F -> C); new classifier copies its weights into the
    # first F columns and its bias, with fresh weights for the H new columns
    # (matches the nn.Linear weight-copy in cascorModel.__init__).
    wc_old = jax.random.normal(kwc_old, (C, F), dtype=jnp.float32) * 0.1
    bc_old = jax.random.normal(kbc, (C,), dtype=jnp.float32) * 0.1
    wc_extra = jax.random.normal(kwc_new, (C, H), dtype=jnp.float32) * 0.1
    wc_new = jnp.concatenate([wc_old, wc_extra], axis=1)   # [C, F+H]
    bc_new = bc_old                                         # [C]

    params, dims = prepare_cascor_params(wh, bh, wc_new, bc_new, F)
    out, feat = jax.block_until_ready(
        cascor_apply(x, params, dims, return_features=True)
    )

    # pure-JAX f32 reference (kernel computes in bf16 with f32 accumulation ->
    # loosened tolerance vs the original 1e-5)
    h_ref = jnp.tanh(x @ wh.T + bh)
    out_ref = jnp.concatenate([x, h_ref], axis=1) @ wc_new.T + bc_new
    assert out.shape == (B, C) and feat.shape == (B, H)
    assert jnp.allclose(out, out_ref, atol=5e-2, rtol=5e-2), "mismatch vs reference"
    assert jnp.allclose(feat, h_ref, atol=5e-2, rtol=5e-2), "feature mismatch vs reference"

    print("KERNEL_OK")
</pallas_src>

<mosaic_0001>
module attributes {stable_mosaic.version = 11 : i64} {
  func.func @cascor_kernel(%arg0: i32, %arg1: memref<16x128xbf16, #tpu.memory_space<vmem>>, %arg2: memref<128x128xbf16, #tpu.memory_space<vmem>>, %arg3: memref<1x128xf32, #tpu.memory_space<vmem>>, %arg4: memref<128x128xbf16, #tpu.memory_space<vmem>>, %arg5: memref<128x128xbf16, #tpu.memory_space<vmem>>, %arg6: memref<1x128xf32, #tpu.memory_space<vmem>>, %arg7: memref<16x256xf32, #tpu.memory_space<vmem>>) attributes {dimension_semantics = [#tpu.dimension_semantics<parallel>], iteration_bounds = array<i64: 1>, scalar_prefetch = 0 : i64, scratch_operands = 0 : i64, tpu.core_type = #tpu.core_type<tc>, window_params = [{transform_indices = @transform_0, window_bounds = array<i64: 16, 128>}, {pipeline_mode = #tpu.pipeline_mode<synchronous>, transform_indices = @transform_1, window_bounds = array<i64: 128, 128>}, {pipeline_mode = #tpu.pipeline_mode<synchronous>, transform_indices = @transform_2, window_bounds = array<i64: 1, 128>}, {pipeline_mode = #tpu.pipeline_mode<synchronous>, transform_indices = @transform_3, window_bounds = array<i64: 128, 128>}, {pipeline_mode = #tpu.pipeline_mode<synchronous>, transform_indices = @transform_4, window_bounds = array<i64: 128, 128>}, {pipeline_mode = #tpu.pipeline_mode<synchronous>, transform_indices = @transform_5, window_bounds = array<i64: 1, 128>}, {transform_indices = @transform_6, window_bounds = array<i64: 16, 256>}]} {
    %c0 = arith.constant 0 : index
    %c0_0 = arith.constant 0 : index
    %0 = vector.load %arg1[%c0, %c0_0] : memref<16x128xbf16, #tpu.memory_space<vmem>>, vector<16x128xbf16>
    %c0_1 = arith.constant 0 : index
    %c0_2 = arith.constant 0 : index
    %1 = vector.load %arg2[%c0_1, %c0_2] : memref<128x128xbf16, #tpu.memory_space<vmem>>, vector<128x128xbf16>
    %cst = arith.constant dense<0.000000e+00> : vector<16x128xf32>
    %2 = tpu.matmul %0, %1, %cst {dimension_numbers = #tpu.dot_dimension_numbers<[1], [0], [0], [1], [0, 0, 1, 1], [], []>} : vector<16x128xbf16>, vector<128x128xbf16>, vector<16x128xf32> -> vector<16x128xf32>
    %c0_3 = arith.constant 0 : index
    %c0_4 = arith.constant 0 : index
    %3 = vector.load %arg3[%c0_3, %c0_4] : memref<1x128xf32, #tpu.memory_space<vmem>>, vector<1x128xf32>
    %4 = vector.broadcast %3 : vector<1x128xf32> to vector<16x128xf32>
    %5 = arith.addf %2, %4 : vector<16x128xf32>
    %6 = math.tanh %5 : vector<16x128xf32>
    %7 = arith.truncf %6 : vector<16x128xf32> to vector<16x128xbf16>
    %c0_5 = arith.constant 0 : index
    %c0_6 = arith.constant 0 : index
    %8 = vector.load %arg4[%c0_5, %c0_6] : memref<128x128xbf16, #tpu.memory_space<vmem>>, vector<128x128xbf16>
    %cst_7 = arith.constant dense<0.000000e+00> : vector<16x128xf32>
    %9 = tpu.matmul %0, %8, %cst_7 {dimension_numbers = #tpu.dot_dimension_numbers<[1], [0], [0], [1], [0, 0, 1, 1], [], []>} : vector<16x128xbf16>, vector<128x128xbf16>, vector<16x128xf32> -> vector<16x128xf32>
    %c0_8 = arith.constant 0 : index
    %c0_9 = arith.constant 0 : index
    %10 = vector.load %arg5[%c0_8, %c0_9] : memref<128x128xbf16, #tpu.memory_space<vmem>>, vector<128x128xbf16>
    %cst_10 = arith.constant dense<0.000000e+00> : vector<16x128xf32>
    %11 = tpu.matmul %7, %10, %cst_10 {dimension_numbers = #tpu.dot_dimension_numbers<[1], [0], [0], [1], [0, 0, 1, 1], [], []>} : vector<16x128xbf16>, vector<128x128xbf16>, vector<16x128xf32> -> vector<16x128xf32>
    %12 = arith.addf %9, %11 : vector<16x128xf32>
    %c0_11 = arith.constant 0 : index
    %c0_12 = arith.constant 0 : index
    %13 = vector.load %arg6[%c0_11, %c0_12] : memref<1x128xf32, #tpu.memory_space<vmem>>, vector<1x128xf32>
    %14 = vector.broadcast %13 : vector<1x128xf32> to vector<16x128xf32>
    %15 = arith.addf %12, %14 : vector<16x128xf32>
    %c0_13 = arith.constant 0 : index
    %c0_14 = arith.constant 0 : index
    %16 = vector.load %arg7[%c0_13, %c0_14] : memref<16x256xf32, #tpu.memory_space<vmem>>, vector<16x128xf32>
    tpu.vector_store %arg7[%c0_13, %c0_14], %15 {strides = array<i32>} : memref<16x256xf32, #tpu.memory_space<vmem>>, vector<16x128xf32>,
    %c0_15 = arith.constant 0 : index
    %c128 = arith.constant 128 : index
    %17 = vector.load %arg7[%c0_15, %c128] : memref<16x256xf32, #tpu.memory_space<vmem>>, vector<16x128xf32>
    tpu.vector_store %arg7[%c0_15, %c128], %6 {strides = array<i32>} : memref<16x256xf32, #tpu.memory_space<vmem>>, vector<16x128xf32>,
    return
  }
  func.func @transform_0(%arg0: i32) -> (i32, i32) {
    %c0_i32 = arith.constant 0 : i32
    %c0_i32_0 = arith.constant 0 : i32
    return %arg0, %c0_i32 : i32, i32
  }
  func.func @transform_1(%arg0: i32) -> (i32, i32) {
    %c0_i32 = arith.constant 0 : i32
    %c0_i32_0 = arith.constant 0 : i32
    %c0_i32_1 = arith.constant 0 : i32
    return %c0_i32, %c0_i32_0 : i32, i32
  }
  func.func @transform_2(%arg0: i32) -> (i32, i32) {
    %c0_i32 = arith.constant 0 : i32
    %c0_i32_0 = arith.constant 0 : i32
    %c0_i32_1 = arith.constant 0 : i32
    return %c0_i32, %c0_i32_0 : i32, i32
  }
  func.func @transform_3(%arg0: i32) -> (i32, i32) {
    %c0_i32 = arith.constant 0 : i32
    %c0_i32_0 = arith.constant 0 : i32
    %c0_i32_1 = arith.constant 0 : i32
    return %c0_i32, %c0_i32_0 : i32, i32
  }
  func.func @transform_4(%arg0: i32) -> (i32, i32) {
    %c0_i32 = arith.constant 0 : i32
    %c0_i32_0 = arith.constant 0 : i32
    %c0_i32_1 = arith.constant 0 : i32
    return %c0_i32, %c0_i32_0 : i32, i32
  }
  func.func @transform_5(%arg0: i32) -> (i32, i32) {
    %c0_i32 = arith.constant 0 : i32
    %c0_i32_0 = arith.constant 0 : i32
    %c0_i32_1 = arith.constant 0 : i32
    return %c0_i32, %c0_i32_0 : i32, i32
  }
  func.func @transform_6(%arg0: i32) -> (i32, i32) {
    %c0_i32 = arith.constant 0 : i32
    %c0_i32_0 = arith.constant 0 : i32
    return %arg0, %c0_i32 : i32, i32
  }
}

</mosaic_0001>

<bundles_post_ra>
// kernel: cascor_apply.1
= control target key start
LH: loop header
LB: loop body
LE: loop exit
PB: predicated region body
PF: predicated region fallthrough
CT: control target
= control target key end

     0   :  { %11 = vsyncpa [#allocation3], 0  ;;  %s617_s0 = inlined_call_operand.vmem [shape: bf16[16,128], index: 0, kind: input, shape index: {}]   ;;  %s618_s1 = inlined_call_operand.hbm [shape: bf16[128,128], index: 1, kind: input, shape index: {}]   ;;  %s619_s2 = inlined_call_operand.vmem [shape: f32[1,128], index: 2, kind: input, shape index: {}]   ;;  %s620_s3 = inlined_call_operand.hbm [shape: bf16[128,128], index: 3, kind: input, shape index: {}]   ;;  %s621_s4 = inlined_call_operand.hbm [shape: bf16[128,128], index: 4, kind: input, shape index: {}]   ;;  %s622_s5 = inlined_call_operand.vmem [shape: f32[1,128], index: 5, kind: input, shape index: {}]   ;;  %s623_s6 = inlined_call_operand.vmem [shape: f32[16,256], index: 6, kind: output, shape index: {}]  }
   0x1   :  { %12 = vsyncpa [#allocation5], 0  ;;  %s34_s23 = sshll.u32 %s620_s3, 4  ;;  %s547_s24 = smov [#allocation4]   ;;  %s35_s23 = int_to_ptr.hbm [resolvable:$true] %s34_s23 }
   0x2   :  { %s36_s25 = sshll.u32 %s547_s24, 4  ;;  %s19_s28 = sshll.u32 %s618_s1, 4  ;;  %s37_s25 = int_to_ptr.vmem [resolvable:$true] %s36_s25  ;;  %s20_s28 = int_to_ptr.hbm [resolvable:$true] %s19_s28 }
   0x3   :  { %s548_s29 = smov 64   ;;  %s549_s30 = smov 4  }
   0x4   :  { %42 = dma.hbm_to_vmem [thread:$0]  %s35_s23, 1024, %s37_s25, [#allocation5], %s548_s29, %s548_s29, %s549_s30  }
   0x5   :  { %s550_s7 = smov [#allocation2]   ;;  %s47_s11 = sshll.u32 %s621_s4, 4  ;;  %s48_s11 = int_to_ptr.hbm [resolvable:$true] %s47_s11 }
   0x6   :  { %s21_s8 = sshll.u32 %s550_s7, 4  ;;  %s551_s3 = smov [#allocation6]   ;;  %s22_s8 = int_to_ptr.vmem [resolvable:$true] %s21_s8 }
   0x7   :  { %27 = dma.hbm_to_vmem [thread:$0]  %s20_s28, 1024, %s22_s8, [#allocation3], %s548_s29, %s548_s29, %s549_s30  }
   0x8   :  { %s49_s12 = sshll.u32 %s551_s3, 4  ;;  %s50_s12 = int_to_ptr.vmem [resolvable:$true] %s49_s12 }
   0x9   :  { %55 = dma.hbm_to_vmem [thread:$0]  %s48_s11, 1024, %s50_s12, [#allocation5], %s548_s29, %s548_s29, %s549_s30  }
   0xa   :  { %543 = dma.done.wait [#allocation3], 1024  }
   0xb   :  { %544 = vsyncadd [#allocation3], 4294966272 }
   0xc   :  { %545 = dma.done.wait [#allocation5], 2048  }
   0xd   :  { %546 = vsyncadd [#allocation5], 4294965248  ;;  %v443_v0 = vld [vmem:[#allocation2 + $0x38] sm:$0xff]  ;;  %v442_v1 = vld [vmem:[#allocation2 + $0x30] sm:$0xff] }
   0xe   :  { %146 = vmatpush.bf16.msra.mxu0 %v443_v0  ;;  %v451_v2 = vld [vmem:[#allocation4 + $0x38] sm:$0xff]  ;;  %v450_v4 = vld [vmem:[#allocation4 + $0x30] sm:$0xff]  ;;  %v441_v5 = vld [vmem:[#allocation2 + $0x28] sm:$0xff] }
   0xf   :  { %v459_v3 = vld [vmem:[#allocation6 + $0x38] sm:$0xff]  ;;  %305 = vmatpush.bf16.msra.mxu2 %v451_v2  ;;  %v458_v6 = vld [vmem:[#allocation6 + $0x30] sm:$0xff]  ;;  %v449_v7 = vld [vmem:[#allocation4 + $0x28] sm:$0xff] }
  0x10   :  { %243 = vmatpush.bf16.msra.mxu1 %v459_v3  ;;  %v440_v8 = vld [vmem:[#allocation2 + $0x20] sm:$0xff]  ;;  %v457_v9 = vld [vmem:[#allocation6 + $0x28] sm:$0xff]  ;;  %v439_v11 = vld [vmem:[#allocation2 + $0x18] sm:$0xff] }
  0x11   :  { %v448_v10 = vld [vmem:[#allocation4 + $0x20] sm:$0xff]  ;;  %v447_v12 = vld [vmem:[#allocation4 + $0x18] sm:$0xff]  ;;  %v438_v13 = vld [vmem:[#allocation2 + $0x10] sm:$0xff] }
  0x12   :  { %147 = vmatpush.bf16.msra.mxu0 %v442_v1  ;;  %v446_v14 = vld [vmem:[#allocation4 + $0x10] sm:$0xff]  ;;  %v437_v15 = vld [vmem:[#allocation2 + $0x8] sm:$0xff]  ;;  %v436_v17 = vld [vmem:[#allocation2] sm:$0xff] }
  0x13   :  { %306 = vmatpush.bf16.msra.mxu2 %v450_v4  ;;  %v445_v16 = vld [vmem:[#allocation4 + $0x8] sm:$0xff]  ;;  %v435_v18 = vld [vmem:[%s617_s0] sm:$0xff]  ;;  %v455_v21 = vld [vmem:[#allocation6 + $0x18] sm:$0xff] }
  0x14   :  { %244 = vmatpush.bf16.msra.mxu1 %v458_v6  ;;  %v456_v19 = vld [vmem:[#allocation6 + $0x20] sm:$0xff]  ;;  %v454_v22 = vld [vmem:[#allocation6 + $0x10] sm:$0xff]  ;;  %v453_v23 = vld [vmem:[#allocation6 + $0x8] sm:$0xff] }
  0x15   :  { %v444_v20 = vld [vmem:[#allocation4] sm:$0xff] }
  0x16   :  { %148 = vmatpush.bf16.msra.mxu0 %v441_v5  ;;  %v452_v24 = vld [vmem:[#allocation6] sm:$0xff] }
  0x17   :  { %307 = vmatpush.bf16.msra.mxu2 %v449_v7  ;;  %v465_v25 = vld [vmem:[%s619_s2] ss:$0 sm:$0xff] }
  0x18   :  { %245 = vmatpush.bf16.msra.mxu1 %v457_v9  ;;  %v466_v34 = vld [vmem:[%s622_s5] ss:$0 sm:$0xff] }
  0x1a   :  { %149 = vmatpush.bf16.msra.mxu0 %v440_v8 }
  0x1b   :  { %308 = vmatpush.bf16.msra.mxu2 %v448_v10 }
  0x1c   :  { %246 = vmatpush.bf16.msra.mxu1 %v456_v19 }
  0x1e   :  { %150 = vmatpush.bf16.msra.mxu0 %v439_v11 }
  0x1f   :  { %309 = vmatpush.bf16.msra.mxu2 %v447_v12 }
  0x20   :  { %247 = vmatpush.bf16.msra.mxu1 %v455_v21 }
  0x22   :  { %151 = vmatpush.bf16.msra.mxu0 %v438_v13 }
  0x23   :  { %310 = vmatpush.bf16.msra.mxu2 %v446_v14 }
  0x24   :  { %248 = vmatpush.bf16.msra.mxu1 %v454_v22 }
  0x26   :  { %152 = vmatpush.bf16.msra.mxu0 %v437_v15 }
  0x27   :  { %311 = vmatpush.bf16.msra.mxu2 %v445_v16 }
  0x28   :  { %249 = vmatpush.bf16.msra.mxu1 %v453_v23 }
  0x2a   :  { %153 = vmatpush.bf16.msra.mxu0 %v436_v17 }
  0x2b   :  { %312 = vmatpush.bf16.msra.mxu2 %v444_v20 }
  0x2c   :  { %250 = vmatpush.bf16.msra.mxu1 %v452_v24 }
  0x2d   :  { %154 = vmatmul.bf16.vlgmr.msra.gmra.mxu0 %v435_v18 }
  0x2e   :  { %313 = vmatmul.bf16.vlgmr.msra.gmra.mxu2 %v435_v18 }
  0xaa   :  { %v155_v26 = vpop.f32.mrf.mxu0 }
  0xab   :  { %v156_v27 = vadd.f32 %v465_v25, %v155_v26 }
  0xad   :  { %467 = vtanh.f32 %v156_v27 }
  0xb1   :  { %v314_v33 = vpop.f32.mrf.mxu2 }
  0xb2   :  { %v157_v28 = vpop.f32.mrf.mxu0 }
  0xb3   :  { %v468_v29 = vpop.eup %467  ;;  %v158_v30 = vadd.f32 %v465_v25, %v157_v28 }
  0xb4   :  { %327 = vst [vmem:[%s623_s6 + $0x8] sm:$0xff] %v468_v29 }
  0xb5   :  { %469 = vtanh.f32 %v158_v30 }
  0xb9   :  { %v316_v38 = vpop.f32.mrf.mxu2 }
  0xbb   :  { %v470_v31 = vpop.eup %469 }
  0xbc   :  { %328 = vst [vmem:[%s623_s6 + $0x18] sm:$0xff] %v470_v31  ;;  %v162_v32 = vpack.c.bf16 %v470_v31, %v468_v29 }
  0xbe   :  { %251 = vmatmul.bf16.vlgmr.msra.gmra.mxu1 %v162_v32 }
 0x13b   :  { %v252_v35 = vpop.f32.mrf.mxu1 }
 0x13c   :  { %v315_v36 = vadd.f32 %v314_v33, %v252_v35 }
 0x13e   :  { %v323_v37 = vadd.f32 %v466_v34, %v315_v36 }
 0x140   :  { %325 = vst [vmem:[%s623_s6] sm:$0xff] %v323_v37 }
 0x143   :  { %v254_v39 = vpop.f32.mrf.mxu1 }
 0x144   :  { %v317_v40 = vadd.f32 %v316_v38, %v254_v39 }
 0x146   :  { %v324_v41 = vadd.f32 %v466_v34, %v317_v40 }
 0x148   :  { %326 = vst [vmem:[%s623_s6 + $0x10] sm:$0xff] %v324_v41 }
 0x149   :  { %333 = vsyncpa [#allocation3], 1 }
 0x14a   :  { %334 = vsyncpa [#allocation5], 1 }

</bundles_post_ra>
